<compile_context>
chip_gen: v5e
topology: v5e:2x2
jax: 0.10.0
libtpu: 0.0.40
codegen_flags: <defaults>
</compile_context>

<pallas_src>
import functools

import jax
import jax.numpy as jnp
from jax.experimental import pallas as pl
from jax.experimental.pallas import tpu as pltpu


def _upconv_kernel(x_ref, w_ref, b_ref, o_ref, *, rh, rw, th, wcols, c_in):
    """One (batch, row-tile) grid step.

    x_ref: (1, TH+RH-1, W+RW-1, C_in)  original-resolution input tile (+halo), compute dtype
    w_ref: (RH*RW*C_in, 4*C_out_pad)   poly-phase weight slab (lane-dense 2-D), compute dtype
    b_ref: (1, 4*C_out_pad)            f32 bias, replicated per phase
    o_ref: (1, TH*W, 4*C_out_pad)      lane-dense output (last dim multiple of 128)
    """
    # im2col once: concat the RH*RW shifted views along channels -> a single big-K matmul.
    taps = []
    for r in range(rh):
        for c in range(rw):
            taps.append(x_ref[0, r:r + th, c:c + wcols, :])          # (TH, W, C_in)
    patch = jnp.concatenate(taps, axis=-1).reshape(th * wcols, rh * rw * c_in)
    acc = jnp.dot(patch, w_ref[...], preferred_element_type=jnp.float32)   # (TH*W, 4*C_out_pad) f32
    o_ref[0] = (acc + b_ref[...]).astype(o_ref.dtype)


def _pick_row_tile(h, w):
    """Largest divisor of h giving ~128 matmul rows (th * w) per grid step."""
    target = max(1, 128 // max(w, 1))
    for t in range(min(h, target), 0, -1):
        if h % t == 0:
            return t
    return h


def upconv_pallas(x_nchw, w_oihw, bias, *, scale_factor=2, compute_dtype=jnp.bfloat16):
    """UpConv forward: nearest-upsample by 2, then Conv2d(padding='same', stride=1)."""
    assert scale_factor == 2, "poly-phase kernel is specialized to the module default scale_factor=2"
    n, c_in, h, w = x_nchw.shape
    c_out, c_in_w, kh, kw = w_oihw.shape
    assert c_in == c_in_w
    out_dtype = x_nchw.dtype

    # ---- poly-phase tap offsets in ORIGINAL resolution ------------------------------------
    # PyTorch padding='same' (stride 1): top/left pad = (k-1)//2.  Output pixel (2i+pi, 2j+pj)
    # reads original-res input rows i + floor((pi+dy-pad_t)/2), cols j + floor((pj+dx-pad_l)/2).
    pad_t, pad_l = (kh - 1) // 2, (kw - 1) // 2
    r_offs = [(pi + dy - pad_t) // 2 for pi in (0, 1) for dy in range(kh)]
    c_offs = [(pj + dx - pad_l) // 2 for pj in (0, 1) for dx in range(kw)]
    r_min, r_max = min(r_offs), max(r_offs)
    c_min, c_max = min(c_offs), max(c_offs)
    rh, rw = r_max - r_min + 1, c_max - c_min + 1

    # ---- fold upsample into the weights: per-phase effective taps (summed in f32) ---------
    w_hwio = jnp.transpose(w_oihw, (2, 3, 1, 0)).astype(jnp.float32)      # (KH, KW, C_in, C_out)
    weff = jnp.zeros((4, rh, rw, c_in, c_out), jnp.float32)               # (phase, r, c, ci, co)
    for pi in range(2):
        for pj in range(2):
            p = 2 * pi + pj
            for dy in range(kh):
                r = (pi + dy - pad_t) // 2 - r_min
                for dx in range(kw):
                    c = (pj + dx - pad_l) // 2 - c_min
                    weff = weff.at[p, r, c].add(w_hwio[dy, dx])

    # Lane-dense layout: pad C_out so (4 phases * C_out_pad) is an exact multiple of 128.
    c_out_pad = ((c_out + 31) // 32) * 32
    n_lanes = 4 * c_out_pad
    weff = jnp.pad(weff, ((0, 0), (0, 0), (0, 0), (0, 0), (0, c_out_pad - c_out)))
    # Single 2-D weight slab: rows ordered (r, c, ci), columns ordered (phase, co).
    w_mat = jnp.transpose(weff, (1, 2, 3, 0, 4)).reshape(rh * rw * c_in, n_lanes).astype(compute_dtype)
    b_mat = jnp.tile(jnp.pad(bias.astype(jnp.float32), (0, c_out_pad - c_out)), 4).reshape(1, n_lanes)

    # ---- input glue at ORIGINAL resolution: NCHW -> NHWC, halo pad, haloed row blocks ------
    x_nhwc = jnp.transpose(x_nchw, (0, 2, 3, 1)).astype(compute_dtype)    # (N, H, W, C_in)
    x_pad = jnp.pad(x_nhwc, ((0, 0), (-r_min, r_max), (-c_min, c_max), (0, 0)))
    w_padded = w + rw - 1

    th = _pick_row_tile(h, w)
    nh = h // th
    # Halo rows are duplicated into each block so BlockSpecs stay non-overlapping (cheap: ~RH-1
    # extra rows per TH original-resolution rows, vs. the old 4x upsampled HBM copy).
    x_blocks = jnp.stack(
        [x_pad[:, hb * th:hb * th + th + rh - 1] for hb in range(nh)], axis=1
    ).reshape(n * nh, th + rh - 1, w_padded, c_in)

    kernel = functools.partial(_upconv_kernel, rh=rh, rw=rw, th=th, wcols=w, c_in=c_in)

    out_k = pl.pallas_call(
        kernel,
        out_shape=jax.ShapeDtypeStruct((n * nh, th * w, n_lanes), out_dtype),
        grid_spec=pltpu.PrefetchScalarGridSpec(
            num_scalar_prefetch=0,
            grid=(n * nh,),
            in_specs=[
                pl.BlockSpec((1, th + rh - 1, w_padded, c_in), lambda i: (i, 0, 0, 0)),
                pl.BlockSpec((rh * rw * c_in, n_lanes), lambda i: (0, 0)),
                pl.BlockSpec((1, n_lanes), lambda i: (0, 0)),
            ],
            out_specs=pl.BlockSpec((1, th * w, n_lanes), lambda i: (i, 0, 0)),
        ),
        compiler_params=pltpu.CompilerParams(
            dimension_semantics=("parallel",),
            vmem_limit_bytes=32 * 1024 * 1024,
        ),
    )(x_blocks, w_mat, b_mat)

    # ---- un-fold phases / padding in the wrapper (cheap XLA reshape + transpose) -----------
    out_k = out_k.reshape(n, nh, th, w, 2, 2, c_out_pad)[..., :c_out]     # (n, hb, i, j, pi, pj, co)
    out = jnp.transpose(out_k, (0, 6, 1, 2, 4, 3, 5)).reshape(n, c_out, 2 * h, 2 * w)
    return out


def upconv_reference(x_nchw, w_oihw, bias, *, scale_factor=2):
    """Pure-JAX reference matching torch.nn.Upsample(scale_factor=2) + Conv2d(padding='same')."""
    kh, kw = w_oihw.shape[2], w_oihw.shape[3]
    x_up = jnp.repeat(jnp.repeat(x_nchw, scale_factor, axis=2), scale_factor, axis=3)
    pad_h_total, pad_w_total = kh - 1, kw - 1
    pad_t, pad_b = pad_h_total // 2, pad_h_total - pad_h_total // 2
    pad_l, pad_r = pad_w_total // 2, pad_w_total - pad_w_total // 2
    out = jax.lax.conv_general_dilated(
        x_up, w_oihw, window_strides=(1, 1),
        padding=[(pad_t, pad_b), (pad_l, pad_r)],
        dimension_numbers=("NCHW", "OIHW", "NCHW"),
    )
    return out + bias[None, :, None, None]


if __name__ == "__main__":
    # Small shapes consistent with the module: N=2, C_in=4 -> C_out=8, 16x16, kernel=3.
    N, C_IN, C_OUT, H, W, K = 2, 4, 8, 16, 16, 3

    key = jax.random.PRNGKey(0)
    kx, kw_, kb = jax.random.split(key, 3)
    x = jax.random.normal(kx, (N, C_IN, H, W), dtype=jnp.float32)
    fan_in = C_IN * K * K
    bound = 1.0 / (fan_in ** 0.5)
    w = jax.random.uniform(kw_, (C_OUT, C_IN, K, K), jnp.float32, -bound, bound)
    b = jax.random.uniform(kb, (C_OUT,), jnp.float32, -bound, bound)

    ref = upconv_reference(x, w, b)

    # f32-matmul path: tight numerical check of the poly-phase / fused-matmul math.
    out_f32 = jax.block_until_ready(upconv_pallas(x, w, b, compute_dtype=jnp.float32))
    assert out_f32.shape == (N, C_OUT, 2 * H, 2 * W), out_f32.shape
    assert jnp.allclose(out_f32, ref, atol=1e-3, rtol=1e-3), "f32 kernel mismatch vs reference"

    # Default perf configuration: bf16 matmul operands, f32 accumulation (v5e/v6e/v7x MXU).
    out = jax.block_until_ready(upconv_pallas(x, w, b))
    assert out.shape == (N, C_OUT, 2 * H, 2 * W), out.shape
    assert jnp.allclose(out, ref, atol=3e-2, rtol=3e-2), "bf16 kernel mismatch vs reference"

    print("KERNEL_OK")
</pallas_src>

<mosaic_0001>
module attributes {stable_mosaic.version = 11 : i64} {
  func.func @_upconv_kernel(%arg0: i32, %arg1: memref<1x10x18x4xf32, #tpu.memory_space<vmem>>, %arg2: memref<36x128xf32, #tpu.memory_space<vmem>>, %arg3: memref<1x128xf32, #tpu.memory_space<vmem>>, %arg4: memref<1x128x128xf32, #tpu.memory_space<vmem>>) attributes {dimension_semantics = [#tpu.dimension_semantics<parallel>], iteration_bounds = array<i64: 4>, scalar_prefetch = 0 : i64, scratch_operands = 0 : i64, tpu.core_type = #tpu.core_type<tc>, window_params = [{transform_indices = @transform_0, window_bounds = array<i64: 1, 10, 18, 4>}, {pipeline_mode = #tpu.pipeline_mode<synchronous>, transform_indices = @transform_1, window_bounds = array<i64: 36, 128>}, {pipeline_mode = #tpu.pipeline_mode<synchronous>, transform_indices = @transform_2, window_bounds = array<i64: 1, 128>}, {transform_indices = @transform_3, window_bounds = array<i64: 1, 128, 128>}]} {
    %c0 = arith.constant 0 : index
    %c0_0 = arith.constant 0 : index
    %c0_1 = arith.constant 0 : index
    %c0_2 = arith.constant 0 : index
    %0 = vector.load %arg1[%c0, %c0_0, %c0_1, %c0_2] : memref<1x10x18x4xf32, #tpu.memory_space<vmem>>, vector<1x8x16x4xf32>
    %1 = vector.shape_cast %0 : vector<1x8x16x4xf32> to vector<8x16x4xf32>
    %c0_3 = arith.constant 0 : index
    %c0_4 = arith.constant 0 : index
    %c1 = arith.constant 1 : index
    %c0_5 = arith.constant 0 : index
    %2 = vector.load %arg1[%c0_3, %c0_4, %c1, %c0_5] : memref<1x10x18x4xf32, #tpu.memory_space<vmem>>, vector<1x8x16x4xf32>
    %3 = vector.shape_cast %2 : vector<1x8x16x4xf32> to vector<8x16x4xf32>
    %c0_6 = arith.constant 0 : index
    %c0_7 = arith.constant 0 : index
    %c2 = arith.constant 2 : index
    %c0_8 = arith.constant 0 : index
    %4 = vector.load %arg1[%c0_6, %c0_7, %c2, %c0_8] : memref<1x10x18x4xf32, #tpu.memory_space<vmem>>, vector<1x8x16x4xf32>
    %5 = vector.shape_cast %4 : vector<1x8x16x4xf32> to vector<8x16x4xf32>
    %c0_9 = arith.constant 0 : index
    %c1_10 = arith.constant 1 : index
    %c0_11 = arith.constant 0 : index
    %c0_12 = arith.constant 0 : index
    %6 = vector.load %arg1[%c0_9, %c1_10, %c0_11, %c0_12] : memref<1x10x18x4xf32, #tpu.memory_space<vmem>>, vector<1x8x16x4xf32>
    %7 = vector.shape_cast %6 : vector<1x8x16x4xf32> to vector<8x16x4xf32>
    %c0_13 = arith.constant 0 : index
    %c1_14 = arith.constant 1 : index
    %c1_15 = arith.constant 1 : index
    %c0_16 = arith.constant 0 : index
    %8 = vector.load %arg1[%c0_13, %c1_14, %c1_15, %c0_16] : memref<1x10x18x4xf32, #tpu.memory_space<vmem>>, vector<1x8x16x4xf32>
    %9 = vector.shape_cast %8 : vector<1x8x16x4xf32> to vector<8x16x4xf32>
    %c0_17 = arith.constant 0 : index
    %c1_18 = arith.constant 1 : index
    %c2_19 = arith.constant 2 : index
    %c0_20 = arith.constant 0 : index
    %10 = vector.load %arg1[%c0_17, %c1_18, %c2_19, %c0_20] : memref<1x10x18x4xf32, #tpu.memory_space<vmem>>, vector<1x8x16x4xf32>
    %11 = vector.shape_cast %10 : vector<1x8x16x4xf32> to vector<8x16x4xf32>
    %c0_21 = arith.constant 0 : index
    %c2_22 = arith.constant 2 : index
    %c0_23 = arith.constant 0 : index
    %c0_24 = arith.constant 0 : index
    %12 = vector.load %arg1[%c0_21, %c2_22, %c0_23, %c0_24] : memref<1x10x18x4xf32, #tpu.memory_space<vmem>>, vector<1x8x16x4xf32>
    %13 = vector.shape_cast %12 : vector<1x8x16x4xf32> to vector<8x16x4xf32>
    %c0_25 = arith.constant 0 : index
    %c2_26 = arith.constant 2 : index
    %c1_27 = arith.constant 1 : index
    %c0_28 = arith.constant 0 : index
    %14 = vector.load %arg1[%c0_25, %c2_26, %c1_27, %c0_28] : memref<1x10x18x4xf32, #tpu.memory_space<vmem>>, vector<1x8x16x4xf32>
    %15 = vector.shape_cast %14 : vector<1x8x16x4xf32> to vector<8x16x4xf32>
    %c0_29 = arith.constant 0 : index
    %c2_30 = arith.constant 2 : index
    %c2_31 = arith.constant 2 : index
    %c0_32 = arith.constant 0 : index
    %16 = vector.load %arg1[%c0_29, %c2_30, %c2_31, %c0_32] : memref<1x10x18x4xf32, #tpu.memory_space<vmem>>, vector<1x8x16x4xf32>
    %17 = vector.shape_cast %16 : vector<1x8x16x4xf32> to vector<8x16x4xf32>
    %18 = tpu.concatenate %1, %3, %5, %7, %9, %11, %13, %15, %17 in 2 : vector<8x16x4xf32>, vector<8x16x4xf32>, vector<8x16x4xf32>, vector<8x16x4xf32>, vector<8x16x4xf32>, vector<8x16x4xf32>, vector<8x16x4xf32>, vector<8x16x4xf32>, vector<8x16x4xf32> -> vector<8x16x36xf32>
    %19 = vector.shape_cast %18 : vector<8x16x36xf32> to vector<128x36xf32>
    %c0_33 = arith.constant 0 : index
    %c0_34 = arith.constant 0 : index
    %20 = vector.load %arg2[%c0_33, %c0_34] : memref<36x128xf32, #tpu.memory_space<vmem>>, vector<36x128xf32>
    %cst = arith.constant dense<0.000000e+00> : vector<128x128xf32>
    %21 = tpu.matmul %19, %20, %cst {dimension_numbers = #tpu.dot_dimension_numbers<[1], [0], [0], [1], [0, 0, 1, 1], [], []>} : vector<128x36xf32>, vector<36x128xf32>, vector<128x128xf32> -> vector<128x128xf32>
    %c0_35 = arith.constant 0 : index
    %c0_36 = arith.constant 0 : index
    %22 = vector.load %arg3[%c0_35, %c0_36] : memref<1x128xf32, #tpu.memory_space<vmem>>, vector<1x128xf32>
    %23 = vector.broadcast %22 : vector<1x128xf32> to vector<128x128xf32>
    %24 = arith.addf %21, %23 : vector<128x128xf32>
    %c0_37 = arith.constant 0 : index
    %c0_38 = arith.constant 0 : index
    %c0_39 = arith.constant 0 : index
    %25 = vector.load %arg4[%c0_37, %c0_38, %c0_39] : memref<1x128x128xf32, #tpu.memory_space<vmem>>, vector<1x128x128xf32>
    %26 = vector.shape_cast %25 : vector<1x128x128xf32> to vector<128x128xf32>
    %27 = vector.shape_cast %24 : vector<128x128xf32> to vector<1x128x128xf32>
    tpu.vector_store %arg4[%c0_37, %c0_38, %c0_39], %27 {strides = array<i32>} : memref<1x128x128xf32, #tpu.memory_space<vmem>>, vector<1x128x128xf32>,
    return
  }
  func.func @transform_0(%arg0: i32) -> (i32, i32, i32, i32) {
    %c0_i32 = arith.constant 0 : i32
    %c0_i32_0 = arith.constant 0 : i32
    %c0_i32_1 = arith.constant 0 : i32
    %c0_i32_2 = arith.constant 0 : i32
    return %arg0, %c0_i32, %c0_i32_0, %c0_i32_1 : i32, i32, i32, i32
  }
  func.func @transform_1(%arg0: i32) -> (i32, i32) {
    %c0_i32 = arith.constant 0 : i32
    %c0_i32_0 = arith.constant 0 : i32
    %c0_i32_1 = arith.constant 0 : i32
    return %c0_i32, %c0_i32_0 : i32, i32
  }
  func.func @transform_2(%arg0: i32) -> (i32, i32) {
    %c0_i32 = arith.constant 0 : i32
    %c0_i32_0 = arith.constant 0 : i32
    %c0_i32_1 = arith.constant 0 : i32
    return %c0_i32, %c0_i32_0 : i32, i32
  }
  func.func @transform_3(%arg0: i32) -> (i32, i32, i32) {
    %c0_i32 = arith.constant 0 : i32
    %c0_i32_0 = arith.constant 0 : i32
    %c0_i32_1 = arith.constant 0 : i32
    return %arg0, %c0_i32, %c0_i32_0 : i32, i32, i32
  }
}

</mosaic_0001>

<bundles_post_ra>
// kernel: tpu_custom_call.1
= control target key start
LH: loop header
LB: loop body
LE: loop exit
PB: predicated region body
PF: predicated region fallthrough
CT: control target
= control target key end

     0   :  { %8 = vsyncpa [#allocation3], 0  ;;  %s2264_s0 = inlined_call_operand.vmem [shape: f32[4,10,18,4], index: 0, kind: input, shape index: {}]   ;;  %s2265_s1 = inlined_call_operand.vmem [shape: f32[36,128], index: 1, kind: input, shape index: {}]   ;;  %s2266_s2 = inlined_call_operand.vmem [shape: f32[1,128], index: 2, kind: input, shape index: {}]   ;;  %s2267_s3 = inlined_call_operand.hbm [shape: f32[4,128,128], index: 3, kind: output, shape index: {}]  }
   0x1   :  { %10 = vsyncpa [#allocation3 + $0x1], 0  ;;  %s1467_s12 = smov 0   ;;  %s1469_s13 = smov 0  }
   0x2   :  { %s1471_s14 = smov 0   ;;  %s1473_s15 = smov 0  }
   0x3 LB: > { %s1488_s16 = sadd.s32 4294967295, %s1436_s15   ;;  %s1184_s17 = sadd.s32 4294967294, %s1436_s15   ;;  %s1436_s15 = sphi %s1473_s15, %s2273_s15   ;;  %s1432_s14 = sphi %s1471_s14, %s2272_s14   ;;  %s1428_s13 = sphi %s1469_s13, %s2271_s13   ;;  %s1424_s12 = sphi %s1467_s12, %s2270_s12  }
   0x4   : > { %s1492_s18 = sadd.s32 1, %s1436_s15   ;;  %s91_s19 = sadd.s32 1, %s1432_s14 }
   0x5   : > { %s88_s20 = ssub.s32 %s1436_s15, %s1492_s18  ;;  %p101_p0 = scmp.ne.s32.totalorder %s1432_s14, %s1428_s13 }
   0x6   : > { %p89_p1 = scmp.eq.s32.totalorder %s88_s20, 0  ;;  %p102_p2 = scmp.eq.s32.totalorder %s1488_s16, 3 }
   0x7   : > { %p107_p3 = scmp.ne.s32.totalorder %s1428_s13, %s1424_s12  ;;  %p108_p4 = scmp.eq.s32.totalorder %s1184_s17, 3 }
   0x8   : > { %s1503_s21 = scalar_select %p89_p1, %s1432_s14, %s91_s19  }
   0x9   : > { %p1505_p5 = por %p102_p2, %p101_p0  ;;  %p1509_p6 = por %p108_p4, %p107_p3 }
   0xa   : > { %p1187_p7 = scmp.ge.s32.totalorder %s1436_s15, 1  ;;  %p140_p8 = scmp.lt.s32.totalorder %s1436_s15, 5 }
   0xc   : > { %p141_p9 = pnand %p1187_p7, %p140_p8 }
   0xd   : > { %p164_p10 = scmp.lt.s32.totalorder (!%p141_p9), %s1488_s16, 3  ;;  %s1438_s29 = smov (!%p141_p9), 4  }
   0xe   : > { %144 = sbr.rel (%p141_p9) target bundleno = 610 (0x262), region = 32  ;;  %s1439_s30 = smov (!%p141_p9), 8  }
   0xf   : > { %s1440_s4 = smov (!%p141_p9), 12   ;;  %s1441_s5 = smov (!%p141_p9), 16  }
  0x10   : > { %s1442_s6 = smov (!%p141_p9), 20   ;;  %s1443_s7 = smov (!%p141_p9), 28  }
  0x11   : > { %s1444_s8 = smov (!%p141_p9), 24   ;;  %s1445_s9 = smov (!%p141_p9), 32  }
  0x12   : > { %s1394_s27 = scalar_lea.hbm (!%p141_p9), %s2267_s3, 512 }
  0x13   : > { %s165_s24 = scalar_select %p164_p10, %s1488_s16, 3  ;;  %vm827_vm0 = vcmask 31744   ;;  %vm844_vm1 = vcmask 64512   ;;  %vm861_vm2 = vcmask 97280   ;;  %vm878_vm3 = vcmask 130048  }
  0x14   : > { %vm1021_vm4 = vcmask 1043456   ;;  %vm895_vm5 = vcmask 162816   ;;  %vm912_vm6 = vcmask 195584   ;;  %vm929_vm7 = vcmask 228352  }
  0x15   : > { %s1324_s25 = smul.u32 240, %s165_s24  ;;  %vm946_vm8 = vcmask 261120   ;;  %vm972_vm9 = vcmask 293888  }
  0x17   : > { %s1520_s28 = scalar_lea.vmem %s2264_s0, %s1324_s25 }
  0x18   : > { %v1523_v0 = vld [vmem:[%s1520_s28 + $0x31] sm:$0xff]  ;;  %v1526_v1 = vld [vmem:[%s1520_s28 + $0x19] sm:$0xff]  ;;  %v185_v2 = vld [vmem:[%s1520_s28 + $0x1] sm:$0xff] }
  0x19   : > { %339 = vrot.lane.b32.xlu2 %v1523_v0, %s1438_s29  ;;  %335 = vrot.lane.b32.xlu1 %v1526_v1, %s1438_s29  ;;  %v1535_v3 = vld [vmem:[%s1520_s28 + $0x39] sm:$0xff]  ;;  %v1538_v4 = vld [vmem:[%s1520_s28 + $0x21] sm:$0xff] }
  0x1a   : > { %331 = vrot.lane.b32.xlu0 %v185_v2, %s1438_s29  ;;  %v186_v5 = vld [vmem:[%s1520_s28 + $0x9] sm:$0xff]  ;;  %v1547_v6 = vld [vmem:[%s1520_s28 + $0x61] sm:$0xff]  ;;  %v1550_v7 = vld [vmem:[%s1520_s28 + $0x51] sm:$0xff] }
  0x1b   : > { %v1553_v8 = vld [vmem:[%s1520_s28 + $0x49] sm:$0xff]  ;;  %v1562_v9 = vld [vmem:[%s1520_s28 + $0x81] sm:$0xff]  ;;  %v1565_v10 = vld [vmem:[%s1520_s28 + $0x79] sm:$0xff] }
  0x1c   : > { %v1568_v11 = vld [vmem:[%s1520_s28 + $0x69] sm:$0xff]  ;;  %v1580_v13 = vld [vmem:[%s1520_s28 + $0x99] sm:$0xff]  ;;  %v1583_v14 = vld [vmem:[%s1520_s28 + $0x91] sm:$0xff] }
  0x1d   : > { %v1577_v12 = vld [vmem:[%s1520_s28 + $0xa9] sm:$0xff]  ;;  %v1594_v17 = vld [vmem:[%s1520_s28 + $0xb1] sm:$0xff]  ;;  %v1607_v20 = vld [vmem:[%s1520_s28 + $0x1a] sm:$0xff] }
  0x1e   : > { %v202_v15 = vld [vmem:[%s1520_s28 + $0xa] sm:$0xff]  ;;  %v201_v16 = vld [vmem:[%s1520_s28 + $0x2] sm:$0xff]  ;;  %v1601_v18 = vld [vmem:[%s1520_s28 + $0x32] sm:$0xff] }
  0x1f   : > { %v1604_v19 = vld [vmem:[%s1520_s28 + $0x22] sm:$0xff]  ;;  %v1616_v21 = vld [vmem:[%s1520_s28 + $0x52] sm:$0xff]  ;;  %v1619_v22 = vld [vmem:[%s1520_s28 + $0x4a] sm:$0xff] }
  0x20   : > { %v1622_v23 = vld [vmem:[%s1520_s28 + $0x3a] sm:$0xff]  ;;  %v1634_v25 = vld [vmem:[%s1520_s28 + $0x6a] sm:$0xff]  ;;  %v1637_v26 = vld [vmem:[%s1520_s28 + $0x62] sm:$0xff] }
  0x21   : > { %341 = vrot.lane.b32.xlu2 %v1535_v3, %s1438_s29  ;;  %337 = vrot.lane.b32.xlu1 %v1538_v4, %s1438_s29  ;;  %v1631_v24 = vld [vmem:[%s1520_s28 + $0x7a] sm:$0xff]  ;;  %v1649_v28 = vld [vmem:[%s1520_s28 + $0x92] sm:$0xff] }
  0x22   : > { %333 = vrot.lane.b32.xlu0 %v186_v5, %s1438_s29  ;;  %v1646_v27 = vld [vmem:[%s1520_s28 + $0x9a] sm:$0xff]  ;;  %v1652_v29 = vld [vmem:[%s1520_s28 + $0x82] sm:$0xff]  ;;  %v1662_v31 = vld [vmem:[%s1520_s28 + $0xb2] sm:$0xff] }
  0x23   : > { %v1190_v30 = vld [vmem:[%s1520_s28 + $0x18] sm:$0xff]  ;;  %v1665_v32 = vld [vmem:[%s1520_s28 + $0xaa] sm:$0xff]  ;;  %v1191_v35 = vld [vmem:[%s1520_s28 + $0x20] sm:$0xff] }
  0x24   : > { %v1673_v33 = vld [vmem:[%s1520_s28 + $0x38] sm:$0xff]  ;;  %v1676_v34 = vld [vmem:[%s1520_s28 + $0x30] sm:$0xff]  ;;  %v1685_v37 = vld [vmem:[%s1520_s28 + $0x60] sm:$0xff] }
  0x25   : > { %v1688_v38 = vld [vmem:[%s1520_s28 + $0x50] sm:$0xff]  ;;  %v1691_v39 = vld [vmem:[%s1520_s28 + $0x48] sm:$0xff]  ;;  %v1702_v41 = vld [vmem:[%s1520_s28 + $0x80] sm:$0xff] }
  0x26   : > { %v1705_v42 = vld [vmem:[%s1520_s28 + $0x78] sm:$0xff]  ;;  %v1708_v43 = vld [vmem:[%s1520_s28 + $0x68] sm:$0xff]  ;;  %v1725_v47 = vld [vmem:[%s1520_s28 + $0x90] sm:$0xff] }
  0x27   : > { %v1719_v45 = vld [vmem:[%s1520_s28 + $0xa8] sm:$0xff]  ;;  %v1722_v46 = vld [vmem:[%s1520_s28 + $0x98] sm:$0xff]  ;;  %v1204_v53 = vld [vmem:[%s1520_s28 + $0xc0] sm:$0xff] }
  0x28   : > { %v1737_v52 = vld [vmem:[%s1520_s28 + $0xc8] sm:$0xff]  ;;  %v1741_v54 = vld [vmem:[%s1520_s28 + $0xb0] sm:$0xff] }
  0x29   : > { %347 = vrot.lane.b32.xlu2 %v1547_v6, %s1438_s29  ;;  %345 = vrot.lane.b32.xlu1 %v1550_v7, %s1438_s29  ;;  %v170_v59 = vld [vmem:[%s1520_s28 + $0x8] sm:$0xff] }
  0x2a   : > { %343 = vrot.lane.b32.xlu0 %v1553_v8, %s1438_s29 }
  0x31   : > { %353 = vrot.lane.b32.xlu2 %v1562_v9, %s1438_s29  ;;  %351 = vrot.lane.b32.xlu1 %v1565_v10, %s1438_s29 }
  0x32   : > { %349 = vrot.lane.b32.xlu0 %v1568_v11, %s1438_s29 }
  0x39   : > { %359 = vrot.lane.b32.xlu2 %v1577_v12, %s1438_s29  ;;  %357 = vrot.lane.b32.xlu1 %v1580_v13, %s1438_s29 }
  0x3a   : > { %355 = vrot.lane.b32.xlu0 %v1583_v14, %s1438_s29 }
  0x41   : > { %397 = vrot.lane.b32.xlu2 %v202_v15, %s1439_s30  ;;  %395 = vrot.lane.b32.xlu1 %v201_v16, %s1439_s30 }
  0x42   : > { %361 = vrot.lane.b32.xlu0 %v1594_v17, %s1438_s29 }
  0x49   : > { %403 = vrot.lane.b32.xlu2 %v1601_v18, %s1439_s30  ;;  %401 = vrot.lane.b32.xlu1 %v1604_v19, %s1439_s30 }
  0x4a   : > { %399 = vrot.lane.b32.xlu0 %v1607_v20, %s1439_s30 }
  0x51   : > { %409 = vrot.lane.b32.xlu2 %v1616_v21, %s1439_s30  ;;  %407 = vrot.lane.b32.xlu1 %v1619_v22, %s1439_s30 }
  0x52   : > { %405 = vrot.lane.b32.xlu0 %v1622_v23, %s1439_s30 }
  0x59   : > { %415 = vrot.lane.b32.xlu2 %v1631_v24, %s1439_s30  ;;  %413 = vrot.lane.b32.xlu1 %v1634_v25, %s1439_s30 }
  0x5a   : > { %411 = vrot.lane.b32.xlu0 %v1637_v26, %s1439_s30 }
  0x61   : > { %421 = vrot.lane.b32.xlu2 %v1646_v27, %s1439_s30  ;;  %419 = vrot.lane.b32.xlu1 %v1649_v28, %s1439_s30 }
  0x62   : > { %417 = vrot.lane.b32.xlu0 %v1652_v29, %s1439_s30 }
  0x69   : > { %459 = vrot.lane.b32.xlu2 %v1190_v30, %s1440_s4  ;;  %425 = vrot.lane.b32.xlu1 %v1662_v31, %s1439_s30 }
  0x6a   : > { %423 = vrot.lane.b32.xlu0 %v1665_v32, %s1439_s30 }
  0x71   : > { %465 = vrot.lane.b32.xlu2 %v1673_v33, %s1440_s4  ;;  %463 = vrot.lane.b32.xlu1 %v1676_v34, %s1440_s4 }
  0x72   : > { %461 = vrot.lane.b32.xlu0 %v1191_v35, %s1440_s4 }
  0x73   : > { %v340_v36 = vpop.permute.xlu2 %339 }
  0x79   : > { %471 = vrot.lane.b32.xlu2 %v1685_v37, %s1440_s4  ;;  %469 = vrot.lane.b32.xlu1 %v1688_v38, %s1440_s4 }
  0x7a   : > { %467 = vrot.lane.b32.xlu0 %v1691_v39, %s1440_s4 }
  0x7b   : > { %v1699_v40 = vpop.permute.xlu2 %341 }
  0x81   : > { %477 = vrot.lane.b32.xlu2 %v1702_v41, %s1440_s4  ;;  %475 = vrot.lane.b32.xlu1 %v1705_v42, %s1440_s4 }
  0x82   : > { %473 = vrot.lane.b32.xlu0 %v1708_v43, %s1440_s4 }
  0x83   : > { %v1716_v44 = vpop.permute.xlu2 %347 }
  0x89   : > { %483 = vrot.lane.b32.xlu2 %v1719_v45, %s1440_s4  ;;  %481 = vrot.lane.b32.xlu1 %v1722_v46, %s1440_s4 }
  0x8a   : > { %479 = vrot.lane.b32.xlu0 %v1725_v47, %s1440_s4 }
  0x8b   : > { %v1733_v48 = vpop.permute.xlu2 %353  ;;  %v336_v49 = vpop.permute.xlu1 %335 }
  0x8c   : > { %v830_v50 = vsel %vm827_vm0, %v1190_v30, %v336_v49  ;;  %v332_v51 = vpop.permute.xlu0 %331 }
  0x91   : > { %489 = vrot.lane.b32.xlu2 %v1737_v52, %s1440_s4  ;;  %487 = vrot.lane.b32.xlu1 %v1204_v53, %s1440_s4 }
  0x92   : > { %485 = vrot.lane.b32.xlu0 %v1741_v54, %s1440_s4 }
  0x93   : > { %v1748_v55 = vpop.permute.xlu2 %359  ;;  %v338_v56 = vpop.permute.xlu1 %337 }
  0x94   : > { %v831_v57 = vsel %vm827_vm0, %v1191_v35, %v338_v56  ;;  %v334_v58 = vpop.permute.xlu0 %333 }
  0x95   : > { %v829_v60 = vsel %vm827_vm0, %v170_v59, %v334_v58  ;;  %v169_v59 = vld [vmem:[%s1520_s28] sm:$0xff] }
  0x99   : > { %527 = vrot.lane.b32.xlu2 %v1523_v0, %s1441_s5  ;;  %525 = vrot.lane.b32.xlu1 %v1538_v4, %s1441_s5 }
  0x9a   : > { %523 = vrot.lane.b32.xlu0 %v1526_v1, %s1441_s5  ;;  %v832_v1 = vsel %vm827_vm0, %v1676_v34, %v340_v36 }
  0x9b   : > { %v398_v61 = vpop.permute.xlu2 %397  ;;  %v346_v62 = vpop.permute.xlu1 %345 }
  0x9c   : > { %v1760_v63 = vsel %vm844_vm1, %v829_v60, %v398_v61  ;;  %v344_v2 = vpop.permute.xlu0 %343  ;;  %v835_v30 = vsel %vm827_vm0, %v1688_v38, %v346_v62  ;;  %v828_v60 = vsel %vm827_vm0, %v169_v59, %v332_v51 }
  0xa1   : > { %533 = vrot.lane.b32.xlu2 %v1550_v7, %s1441_s5  ;;  %531 = vrot.lane.b32.xlu1 %v1553_v8, %s1441_s5 }
  0xa2   : > { %529 = vrot.lane.b32.xlu0 %v1535_v3, %s1441_s5 }
  0xa3   : > { %v404_v4 = vpop.permute.xlu2 %403  ;;  %v352_v5 = vpop.permute.xlu1 %351 }
  0xa4   : > { %v1771_v15 = vsel %vm844_vm1, %v832_v1, %v404_v4  ;;  %v350_v16 = vpop.permute.xlu0 %349  ;;  %v838_v61 = vsel %vm827_vm0, %v1705_v42, %v352_v5 }
  0xa9   : > { %539 = vrot.lane.b32.xlu2 %v1565_v10, %s1441_s5  ;;  %537 = vrot.lane.b32.xlu1 %v1568_v11, %s1441_s5 }
  0xaa   : > { %535 = vrot.lane.b32.xlu0 %v1547_v6, %s1441_s5 }
  0xab   : > { %v410_v35 = vpop.permute.xlu2 %409  ;;  %v358_v36 = vpop.permute.xlu1 %357 }
  0xac   : > { %v1782_v49 = vsel %vm844_vm1, %v835_v30, %v410_v35  ;;  %v356_v56 = vpop.permute.xlu0 %355  ;;  %v841_v51 = vsel %vm827_vm0, %v1722_v46, %v358_v36  ;;  %v834_v36 = vsel %vm827_vm0, %v1691_v39, %v344_v2 }
  0xad   : > { %v840_v58 = vsel %vm827_vm0, %v1725_v47, %v356_v56 }
  0xb1   : > { %545 = vrot.lane.b32.xlu2 %v1580_v13, %s1441_s5  ;;  %543 = vrot.lane.b32.xlu1 %v1583_v14, %s1441_s5 }
  0xb2   : > { %541 = vrot.lane.b32.xlu0 %v1562_v9, %s1441_s5 }
  0xb3   : > { %v416_v62 = vpop.permute.xlu2 %415  ;;  %v396_v1 = vpop.permute.xlu1 %395 }
  0xb4   : > { %v1797_v4 = vsel %vm844_vm1, %v838_v61, %v416_v62  ;;  %v845_v30 = vsel %vm844_vm1, %v828_v60, %v396_v1  ;;  %v362_v35 = vpop.permute.xlu0 %361 }
  0xb9   : > { %611 = vrot.lane.b32.xlu2 %v1665_v32, %s1442_s6  ;;  %603 = vrot.lane.b32.xlu1 %v1631_v24, %s1442_s6 }
  0xba   : > { %547 = vrot.lane.b32.xlu0 %v1577_v12, %s1441_s5 }
  0xbb   : > { %v422_v5 = vpop.permute.xlu2 %421  ;;  %v402_v56 = vpop.permute.xlu1 %401 }
  0xbc   : > { %v1809_v59 = vsel %vm844_vm1, %v841_v51, %v422_v5  ;;  %v848_v60 = vsel %vm844_vm1, %v831_v57, %v402_v56  ;;  %v400_v61 = vpop.permute.xlu0 %399  ;;  %v1829_v56 = vld [vmem:[%s1520_s28 + $0xc2] sm:$0xff] }
  0xbd   : > { %v847_v62 = vsel %vm844_vm1, %v830_v50, %v400_v61  ;;  %v833_v50 = vsel %vm827_vm0, %v1673_v33, %v1699_v40  ;;  %v837_v40 = vsel %vm827_vm0, %v1708_v43, %v350_v16  ;;  %v836_v61 = vsel %vm827_vm0, %v1685_v37, %v1716_v44 }
  0xbe   : > { %v839_v44 = vsel %vm827_vm0, %v1702_v41, %v1733_v48 }
  0xc1   : > { %731 = vrot.lane.b32.xlu2 %v1583_v14, %s1443_s7  ;;  %675 = vrot.lane.b32.xlu1 %v1204_v53, %s1444_s8 }
  0xc2   : > { %667 = vrot.lane.b32.xlu0 %v1725_v47, %s1444_s8  ;;  %v1832_v47 = vld [vmem:[%s1520_s28 + $0xc1] sm:$0xff] }
  0xc3   : > { %v460_v57 = vpop.permute.xlu2 %459  ;;  %v408_v1 = vpop.permute.xlu1 %407 }
  0xc4   : > { %v1824_v51 = vsel %vm861_vm2, %v845_v30, %v460_v57  ;;  %v851_v14 = vsel %vm844_vm1, %v834_v36, %v408_v1  ;;  %v406_v5 = vpop.permute.xlu0 %405 }
  0xc5   : > { %v850_v53 = vsel %vm844_vm1, %v833_v50, %v406_v5 }
  0xc9   : > { %803 = vrot.lane.b32.xlu2 %v1829_v56, %s1445_s9  ;;  %795 = vrot.lane.b32.xlu1 %v1649_v28, %s1445_s9 }
  0xca   : > { %739 = vrot.lane.b32.xlu0 %v1832_v47, %s1443_s7 }
  0xcb   : > { %v466_v2 = vpop.permute.xlu2 %465  ;;  %v414_v30 = vpop.permute.xlu1 %413 }
  0xcc   : > { %v1846_v36 = vsel %vm861_vm2, %v848_v60, %v466_v2  ;;  %v854_v57 = vsel %vm844_vm1, %v837_v40, %v414_v30  ;;  %v412_v1 = vpop.permute.xlu0 %411 }
  0xcd   : > { %v853_v50 = vsel %vm844_vm1, %v836_v61, %v412_v1 }
  0xd1   : > { %549 = vrot.lane.b32.xlu2 %v1594_v17, %s1441_s5  ;;  %595 = vrot.lane.b32.xlu1 %v1619_v22, %s1442_s6 }
  0xd2   : > { %587 = vrot.lane.b32.xlu0 %v1607_v20, %s1442_s6  ;;  %v843_v20 = vsel %vm827_vm0, %v1741_v54, %v362_v35 }
  0xd3   : > { %v472_v16 = vpop.permute.xlu2 %471  ;;  %v420_v5 = vpop.permute.xlu1 %419 }
  0xd4   : > { %v1860_v60 = vsel %vm861_vm2, %v851_v14, %v472_v16  ;;  %v857_v40 = vsel %vm844_vm1, %v840_v58, %v420_v5  ;;  %v418_v2 = vpop.permute.xlu0 %417  ;;  %v842_v58 = vsel %vm827_vm0, %v1719_v45, %v1748_v55 }
  0xd5   : > { %v856_v30 = vsel %vm844_vm1, %v839_v44, %v418_v2 }
  0xd9   : > { %605 = vrot.lane.b32.xlu2 %v1652_v29, %s1442_s6  ;;  %659 = vrot.lane.b32.xlu1 %v1685_v37, %s1444_s8 }
  0xda   : > { %651 = vrot.lane.b32.xlu0 %v1676_v34, %s1444_s8 }
  0xdb   : > { %v478_v48 = vpop.permute.xlu2 %477  ;;  %v426_v14 = vpop.permute.xlu1 %425 }
  0xdc   : > { %v1876_v61 = vsel %vm861_vm2, %v854_v57, %v478_v48  ;;  %v860_v1 = vsel %vm844_vm1, %v843_v20, %v426_v14  ;;  %v424_v16 = vpop.permute.xlu0 %423  ;;  %v1905_v20 = vld [vmem:[%s1520_s28 + $0xc9] sm:$0xff] }
  0xdd   : > { %v859_v37 = vsel %vm844_vm1, %v842_v58, %v424_v16  ;;  %v1922_v58 = vld [vmem:[%s1520_s28 + $0xca] sm:$0xff] }
  0xe1   : > { %723 = vrot.lane.b32.xlu2 %v1547_v6, %s1443_s7  ;;  %715 = vrot.lane.b32.xlu1 %v1523_v0, %s1443_s7 }
  0xe2   : > { %613 = vrot.lane.b32.xlu0 %v1662_v31, %s1442_s6 }
  0xe3   : > { %v484_v34 = vpop.permute.xlu2 %483  ;;  %v464_v55 = vpop.permute.xlu1 %463 }
  0xe4   : > { %v1887_v35 = vsel %vm861_vm2, %v857_v40, %v484_v34  ;;  %v864_v57 = vsel %vm861_vm2, %v847_v62, %v464_v55  ;;  %v462_v5 = vpop.permute.xlu0 %461 }
  0xe5   : > { %v863_v44 = vsel %vm861_vm2, %v1760_v63, %v462_v5 }
  0xe9   : > { %779 = vrot.lane.b32.xlu2 %v1601_v18, %s1445_s9  ;;  %677 = vrot.lane.b32.xlu1 %v1737_v52, %s1444_s8 }
  0xea   : > { %669 = vrot.lane.b32.xlu0 %v1722_v46, %s1444_s8 }
  0xeb   : > { %v490_v0 = vpop.permute.xlu2 %489  ;;  %v470_v6 = vpop.permute.xlu1 %469 }
  0xec   : > { %v1899_v40 = vsel %vm861_vm2, %v860_v1, %v490_v0  ;;  %v867_v62 = vsel %vm861_vm2, %v850_v53, %v470_v6  ;;  %v468_v2 = vpop.permute.xlu0 %467  ;;  %v965_v6 = vld [vmem:[%s2265_s1 + $0x10] sm:$0xff] }
  0xed   : > { %v866_v63 = vsel %vm861_vm2, %v1771_v15, %v468_v2 }
  0xf1   : > { %741 = vrot.lane.b32.xlu2 %v1905_v20, %s1443_s7  ;;  %733 = vrot.lane.b32.xlu1 %v1580_v13, %s1443_s7 }
  0xf2   : > { %787 = vrot.lane.b32.xlu0 %v1637_v26, %s1445_s9 }
  0xf3   : > { %v528_v46 = vpop.permute.xlu2 %527  ;;  %v476_v52 = vpop.permute.xlu1 %475 }
  0xf4   : > { %v1914_v53 = vsel %vm878_vm3, %v864_v57, %v528_v46  ;;  %v1917_v48 = vsel %vm861_vm2, %v853_v50, %v476_v52  ;;  %v474_v15 = vpop.permute.xlu0 %473  ;;  %v963_v52 = vld [vmem:[%s2265_s1] sm:$0xff] }
  0xf5   : > { %v869_v14 = vsel %vm861_vm2, %v1782_v49, %v474_v15 }
  0xf9   : > { %589 = vrot.lane.b32.xlu2 %v1604_v19, %s1442_s6  ;;  %805 = vrot.lane.b32.xlu1 %v1922_v58, %s1445_s9 }
  0xfa   : > { %797 = vrot.lane.b32.xlu0 %v1646_v27, %s1445_s9 }
  0xfb   : > { %v534_v13 = vpop.permute.xlu2 %533  ;;  %v482_v1 = vpop.permute.xlu1 %481 }
  0xfc   : > { %v1931_v50 = vsel %vm878_vm3, %v867_v62, %v534_v13  ;;  %v873_v16 = vsel %vm861_vm2, %v856_v30, %v482_v1  ;;  %v480_v34 = vpop.permute.xlu0 %479  ;;  %v1268_v13 = vld [vmem:[%s1520_s28 + $0xd9] sm:$0xff] }
  0xfd   : > { %v1936_v49 = vsel %vm861_vm2, %v1797_v4, %v480_v34 }
 0x101   : > { %653 = vrot.lane.b32.xlu2 %v1673_v33, %s1444_s8  ;;  %551 = vrot.lane.b32.xlu1 %v1832_v47, %s1441_s5 }
 0x102   : > { %597 = vrot.lane.b32.xlu0 %v1616_v21, %s1442_s6 }
 0x103   : > { %v1944_v19 = vpop.permute.xlu2 %539  ;;  %v488_v55 = vpop.permute.xlu1 %487 }
 0x104   : > { %v1947_v57 = vsel %vm861_vm2, %v859_v37, %v488_v55  ;;  %v486_v30 = vpop.permute.xlu0 %485  ;;  %v1284_v55 = vld [vmem:[%s1520_s28 + $0xda] sm:$0xff] }
 0x105   : > { %v1951_v4 = vsel %vm861_vm2, %v1809_v59, %v486_v30 }
 0x109   : > { %615 = vrot.lane.b32.xlu2 %v1829_v56, %s1442_s6  ;;  %607 = vrot.lane.b32.xlu1 %v1649_v28, %s1442_s6 }
 0x10a   : > { %661 = vrot.lane.b32.xlu0 %v1708_v43, %s1444_s8 }
 0x10b   : > { %v546_v33 = vpop.permute.xlu2 %545  ;;  %v526_v47 = vpop.permute.xlu1 %525 }
 0x10c   : > { %v1960_v5 = vsel %vm878_vm3, %v873_v16, %v546_v33  ;;  %v1963_v37 = vsel %vm878_vm3, %v863_v44, %v526_v47  ;;  %v524_v0 = vpop.permute.xlu0 %523 }
 0x10d   : > { %v1967_v59 = vsel %vm878_vm3, %v1824_v51, %v524_v0  ;;  %v967_v51 = vld [vmem:[%s2265_s1 + $0x20] sm:$0xf] }
 0x10e   : > { %1310 = vmatpush.msk.msra.mxu2 %vm1021_vm4, %v967_v51  ;;  %1311 = vmatpush.msk.msra.mxu3 %vm1021_vm4, %v967_v51 }
 0x10f   : > { %1286 = vmatpush.msk.msra.mxu0 %vm1021_vm4, %v967_v51  ;;  %1309 = vmatpush.msk.msra.mxu1 %vm1021_vm4, %v967_v51 }
 0x111   : > { %671 = vrot.lane.b32.xlu2 %v1719_v45, %s1444_s8  ;;  %725 = vrot.lane.b32.xlu1 %v1568_v11, %s1443_s7  ;;  %v1252_v11 = vld [vmem:[%s1520_s28 + $0xd8] sm:$0xff] }
 0x112   : > { %717 = vrot.lane.b32.xlu0 %v1535_v3, %s1443_s7  ;;  %v966_v3 = vld [vmem:[%s2265_s1 + $0x18] sm:$0xff] }
 0x113   : > { %v1975_v28 = vpop.permute.xlu2 %611  ;;  %v532_v43 = vpop.permute.xlu1 %531  ;;  %1313 = vmatpush.msra.mxu2 %v966_v3  ;;  %1314 = vmatpush.msra.mxu3 %v966_v3 }
 0x114   : > { %v1978_v56 = vsel %vm878_vm3, %v866_v63, %v532_v43  ;;  %v530_v44 = vpop.permute.xlu0 %529  ;;  %1037 = vmatpush.msra.mxu0 %v966_v3  ;;  %1312 = vmatpush.msra.mxu1 %v966_v3 }
 0x115   : > { %v1985_v45 = vsel %vm878_vm3, %v1846_v36, %v530_v44  ;;  %1316 = vmatpush.msra.mxu2 %v965_v6  ;;  %v964_v36 = vld [vmem:[%s2265_s1 + $0x8] sm:$0xff]  ;;  %1317 = vmatpush.msra.mxu3 %v965_v6 }
 0x116   : > { %1038 = vmatpush.msra.mxu0 %v965_v6  ;;  %1315 = vmatpush.msra.mxu1 %v965_v6 }
 0x117   : > { %1319 = vmatpush.msra.mxu2 %v964_v36  ;;  %1320 = vmatpush.msra.mxu3 %v964_v36 }
 0x118   : > { %1039 = vmatpush.msra.mxu0 %v964_v36  ;;  %1318 = vmatpush.msra.mxu1 %v964_v36  ;;  %v1269_v36 = vld [vmem:[%s1520_s28 + $0xe1] sm:$0xff] }
 0x119   : > { %789 = vrot.lane.b32.xlu2 %v1634_v25, %s1445_s9  ;;  %781 = vrot.lane.b32.xlu1 %v1622_v23, %s1445_s9 }
 0x11a   : > { %679 = vrot.lane.b32.xlu0 %v1252_v11, %s1444_s8  ;;  %1322 = vmatpush.msra.mxu2 %v963_v52 }
 0x11b   : > { %v732_v62 = vpop.permute.xlu2 %731  ;;  %v538_v2 = vpop.permute.xlu1 %537  ;;  %1323 = vmatpush.msra.mxu3 %v963_v52  ;;  %1040 = vmatpush.msra.mxu0 %v963_v52 }
 0x11c   : > { %v2003_v63 = vsel %vm878_vm3, %v869_v14, %v538_v2  ;;  %v536_v46 = vpop.permute.xlu0 %535  ;;  %1321 = vmatpush.msra.mxu1 %v963_v52 }
 0x11d   : > { %v2010_v15 = vsel %vm878_vm3, %v1860_v60, %v536_v46 }
 0x121   : > { %799 = vrot.lane.b32.xlu2 %v1665_v32, %s1445_s9  ;;  %743 = vrot.lane.b32.xlu1 %v1268_v13, %s1443_s7 }
 0x122   : > { %735 = vrot.lane.b32.xlu0 %v1577_v12, %s1443_s7 }
 0x123   : > { %v804_v14 = vpop.permute.xlu2 %803  ;;  %v544_v60 = vpop.permute.xlu1 %543 }
 0x124   : > { %v2020_v1 = vsel %vm878_vm3, %v1936_v49, %v544_v60  ;;  %v542_v16 = vpop.permute.xlu0 %541  ;;  %v887_v49 = vsel %vm878_vm3, %v1917_v48, %v1944_v19 }
 0x125   : > { %v2024_v34 = vsel %vm878_vm3, %v1876_v61, %v542_v16 }
 0x129   : > { %599 = vrot.lane.b32.xlu2 %v1637_v26, %s1442_s6  ;;  %591 = vrot.lane.b32.xlu1 %v1601_v18, %s1442_s6 }
 0x12a   : > { %807 = vrot.lane.b32.xlu0 %v1284_v55, %s1445_s9 }
 0x12b   : > { %v2032_v12 = vpop.permute.xlu2 %549  ;;  %v604_v32 = vpop.permute.xlu1 %603 }
 0x12c   : > { %v548_v30 = vpop.permute.xlu0 %547  ;;  %v904_v33 = vsel %vm895_vm5, %v887_v49, %v604_v32 }
 0x131   : > { %663 = vrot.lane.b32.xlu2 %v1705_v42, %s1444_s8  ;;  %655 = vrot.lane.b32.xlu1 %v1691_v39, %s1444_s8  ;;  %v891_v42 = vsel %vm878_vm3, %v1887_v35, %v548_v30 }
 0x132   : > { %553 = vrot.lane.b32.xlu0 %v1905_v20, %s1441_s5  ;;  %v908_v20 = vsel %vm895_vm5, %v891_v42, %v1975_v28 }
 0x133   : > { %v2040_v61 = vpop.permute.xlu2 %605  ;;  %v676_v26 = vpop.permute.xlu1 %675 }
 0x134   : > { %v668_v18 = vpop.permute.xlu0 %667  ;;  %v925_v47 = vsel %vm912_vm6, %v908_v20, %v676_v26 }
 0x135   : > { %v921_v39 = vsel %vm912_vm6, %v904_v33, %v668_v18 }
 0x136   : > { %v938_v19 = vsel %vm929_vm7, %v921_v39, %v732_v62 }
 0x139   : > { %617 = vrot.lane.b32.xlu1 %v1922_v58, %s1442_s6  ;;  %719 = vrot.lane.b32.xlu2 %v1553_v8, %s1443_s7 }
 0x13a   : > { %609 = vrot.lane.b32.xlu0 %v1646_v27, %s1442_s6  ;;  %v1253_v27 = vld [vmem:[%s1520_s28 + $0xe0] sm:$0xff] }
 0x13b   : > { %v724_v48 = vpop.permute.xlu2 %723  ;;  %v796_v35 = vpop.permute.xlu1 %795 }
 0x13c   : > { %v740_v0 = vpop.permute.xlu0 %739  ;;  %v955_v58 = vsel %vm946_vm8, %v938_v19, %v796_v35 }
 0x13d   : > { %v942_v43 = vsel %vm929_vm7, %v925_v47, %v740_v0  ;;  %1295 = vmatmul.msk.f32.vlgmr.msra.gmra.mxu2 %vm972_vm9, %v955_v58 }
 0x13e   : > { %v959_v8 = vsel %vm946_vm8, %v942_v43, %v804_v14 }
 0x13f   : > { %1299 = vmatmul.msk.f32.vlgmr.msra.gmra.mxu3 %vm972_vm9, %v959_v8 }
 0x141   : > { %673 = vrot.lane.b32.xlu1 %v1741_v54, %s1444_s8  ;;  %681 = vrot.lane.b32.xlu2 %v1253_v27, %s1444_s8  ;;  %v1285_v54 = vld [vmem:[%s1520_s28 + $0xe2] sm:$0xff]  ;;  %s161_s28 = sand.u32 1, %s1428_s13  }
 0x142   : > { %727 = vrot.lane.b32.xlu0 %v1565_v10, %s1443_s7  ;;  %s1188_s4 = sshll.u32 %s161_s28, 7  ;;  %s1107_s20 = scalar_lea.sflag [#allocation3], %s161_s28 }
 0x143   : > { %v596_v28 = vpop.permute.xlu1 %595  ;;  %v780_v51 = vpop.permute.xlu2 %779 }
 0x144   : > { %v588_v44 = vpop.permute.xlu0 %587  ;;  %v900_v52 = vsel %vm895_vm5, %v1978_v56, %v596_v28  ;;  %v892_v56 = vsel %vm878_vm3, %v1951_v4, %v2032_v12 }
 0x145   : > { %v896_v10 = vsel %vm895_vm5, %v1967_v59, %v588_v44 }
 0x149   : > { %791 = vrot.lane.b32.xlu1 %v1631_v24, %s1445_s9  ;;  %737 = vrot.lane.b32.xlu2 %v1594_v17, %s1443_s7 }
 0x14a   : > { %783 = vrot.lane.b32.xlu0 %v1619_v22, %s1445_s9 }
 0x14b   : > { %v660_v3 = vpop.permute.xlu1 %659  ;;  %v742_v6 = vpop.permute.xlu2 %741 }
 0x14c   : > { %v652_v11 = vpop.permute.xlu0 %651  ;;  %v917_v13 = vsel %vm912_vm6, %v900_v52, %v660_v3 }
 0x14d   : > { %v913_v17 = vsel %vm912_vm6, %v896_v10, %v652_v11 }
 0x151   : > { %801 = vrot.lane.b32.xlu1 %v1662_v31, %s1445_s9  ;;  %809 = vrot.lane.b32.xlu2 %v1285_v54, %s1445_s9 }
 0x152   : > { %745 = vrot.lane.b32.xlu0 %v1269_v36, %s1443_s7 }
 0x153   : > { %v716_v24 = vpop.permute.xlu1 %715  ;;  %v590_v46 = vpop.permute.xlu2 %589 }
 0x154   : > { %v930_v22 = vsel %vm929_vm7, %v913_v17, %v716_v24  ;;  %v614_v62 = vpop.permute.xlu0 %613  ;;  %v897_v47 = vsel %vm895_vm5, %v1963_v37, %v590_v46 }
 0x155   : > { %v947_v2 = vsel %vm946_vm8, %v930_v22, %v780_v51 }
 0x156   : > { %1287 = vmatmul.msk.f32.vlgmr.msra.gmra.mxu0 %vm972_vm9, %v947_v2 }
 0x159   : > { %601 = vrot.lane.b32.xlu1 %v1634_v25, %s1442_s6  ;;  %657 = vrot.lane.b32.xlu2 %v1688_v38, %s1444_s8 }
 0x15a   : > { %593 = vrot.lane.b32.xlu0 %v1622_v23, %s1442_s6  ;;  %v934_v23 = vsel %vm929_vm7, %v917_v13, %v724_v48 }
 0x15b   : > { %v678_v31 = vpop.permute.xlu1 %677  ;;  %v654_v25 = vpop.permute.xlu2 %653 }
 0x15c   : > { %v670_v59 = vpop.permute.xlu0 %669  ;;  %v914_v0 = vsel %vm912_vm6, %v897_v47, %v654_v25 }
 0x161   : > { %721 = vrot.lane.b32.xlu1 %v1550_v7, %s1443_s7  ;;  %729 = vrot.lane.b32.xlu2 %v1562_v9, %s1443_s7  ;;  %v909_v7 = vsel %vm895_vm5, %v892_v56, %v614_v62  ;;  %s2178_s7 = scalar_lea.vmem [#allocation2], %s1188_s4 }
 0x162   : > { %665 = vrot.lane.b32.xlu0 %v1702_v41, %s1444_s8  ;;  %v926_v9 = vsel %vm912_vm6, %v909_v7, %v678_v31  ;;  %v905_v41 = vsel %vm895_vm5, %v2024_v34, %v2040_v61  ;;  %s1308_s8 = sshll.u32 %s1488_s16, 7  ;;  %s1119_s17 = sshll.u32 %s2178_s7, 4  ;;  %s1120_s17 = int_to_ptr.vmem [resolvable:$true] %s1119_s17 }
 0x163   : > { %v734_v38 = vpop.permute.xlu1 %733  ;;  %v922_v16 = vsel %vm912_vm6, %v905_v41, %v670_v59  ;;  %v943_v4 = vsel %vm929_vm7, %v926_v9, %v742_v6  ;;  %v616_v26 = vpop.permute.xlu2 %615  ;;  %s1118_s11 = scalar_lea.hbm %s2267_s3, %s1308_s8 }
 0x164   : > { %v788_v14 = vpop.permute.xlu0 %787  ;;  %v939_v12 = vsel %vm929_vm7, %v922_v16, %v734_v38  ;;  %s1121_s19 = sshll.u32 %s1118_s11, 4  ;;  %s1122_s19 = int_to_ptr.hbm [resolvable:$true] %s1121_s19 }
 0x165   : > { %v951_v60 = vsel %vm946_vm8, %v934_v23, %v788_v14  ;;  %s1388_s16 = sshra.s32 %s1122_s19, 4  ;;  %s1389_s16 = int_to_ptr.hbm [resolvable:$true] %s1388_s16 }
 0x166   : > { %1291 = vmatmul.msk.f32.vlgmr.msra.gmra.mxu1 %vm972_vm9, %v951_v60  ;;  %s1390_s24 = scalar_lea.hbm %s1389_s16, 128  ;;  %p1395_p0 = scmp.lt.s32.totalorder %s1389_s16, %s2267_s3 }
 0x167   : > { %p1391_p11 = scmp.ne.s32.totalorder %s1389_s16, %s1390_s24  ;;  %p1396_p1 = scmp.lt.s32.totalorder %s1394_s27, %s1390_s24 }
 0x169   : > { %793 = vrot.lane.b32.xlu1 %v1652_v29, %s1445_s9  ;;  %p1392_p12 = pnand %p1391_p11, %p1505_p5  ;;  %p1397_p2 = por %p1396_p1, %p1395_p0 }
 0x16a   : > { %785 = vrot.lane.b32.xlu0 %v1616_v21, %s1445_s9 }
 0x16b   : > { %v806_v55 = vpop.permute.xlu1 %805  ;;  %v672_v21 = vpop.permute.xlu2 %671  ;;  %p1393_p13 = pneg %p1392_p12 }
 0x16c   : > { %v798_v32 = vpop.permute.xlu0 %797  ;;  %v960_v30 = vsel %vm946_vm8, %v943_v4, %v806_v55 }
 0x16d   : > { %v956_v29 = vsel %vm946_vm8, %v939_v12, %v798_v32  ;;  %1300 = vmatmul.msk.f32.gmra.mxu3 %vm972_vm9, %v960_v30  ;;  %p1398_p3 = pnand %p1397_p2, %p1393_p13 }
 0x16e   : > { %1296 = vmatmul.msk.f32.gmra.mxu2 %vm972_vm9, %v956_v29 }
 0x173   : > { %v552_v34 = vpop.permute.xlu1 %551  ;;  %v790_v33 = vpop.permute.xlu2 %789 }
 0x174   : > { %v598_v61 = vpop.permute.xlu0 %597  ;;  %v893_v6 = vsel %vm878_vm3, %v1947_v57, %v552_v34 }
 0x175   : > { %v901_v42 = vsel %vm895_vm5, %v1931_v50, %v598_v61  ;;  %v910_v36 = vsel %vm895_vm5, %v893_v6, %v616_v26 }
 0x17b   : > { %v608_v18 = vpop.permute.xlu1 %607  ;;  %v800_v58 = vpop.permute.xlu2 %799 }
 0x17c   : > { %v662_v49 = vpop.permute.xlu0 %661  ;;  %v906_v28 = vsel %vm895_vm5, %v2020_v1, %v608_v18 }
 0x17d   : > { %v918_v39 = vsel %vm912_vm6, %v901_v42, %v662_v49  ;;  %v923_v3 = vsel %vm912_vm6, %v906_v28, %v672_v21 }
 0x183   : > { %v726_v20 = vpop.permute.xlu1 %725  ;;  %v600_v11 = vpop.permute.xlu2 %599 }
 0x184   : > { %v935_v48 = vsel %vm929_vm7, %v918_v39, %v726_v20  ;;  %v718_v35 = vpop.permute.xlu0 %717  ;;  %v902_v14 = vsel %vm895_vm5, %v2010_v15, %v600_v11 }
 0x185   : > { %v952_v19 = vsel %vm946_vm8, %v935_v48, %v790_v33  ;;  %v931_v43 = vsel %vm929_vm7, %v914_v0, %v718_v35 }
 0x186   : > { %1292 = vmatmul.msk.f32.gmra.mxu1 %vm972_vm9, %v952_v19 }
 0x18b   : > { %v782_v8 = vpop.permute.xlu1 %781  ;;  %v664_v62 = vpop.permute.xlu2 %663 }
 0x18c   : > { %v680_v50 = vpop.permute.xlu0 %679  ;;  %v948_v27 = vsel %vm946_vm8, %v931_v43, %v782_v8  ;;  %v919_v60 = vsel %vm912_vm6, %v902_v14, %v664_v62 }
 0x18d   : > { %1288 = vmatmul.msk.f32.gmra.mxu0 %vm972_vm9, %v948_v27  ;;  %v927_v10 = vsel %vm912_vm6, %v910_v36, %v680_v50 }
 0x193   : > { %v744_v44 = vpop.permute.xlu1 %743  ;;  %v720_v31 = vpop.permute.xlu2 %719 }
 0x194   : > { %v736_v51 = vpop.permute.xlu0 %735  ;;  %v944_v1 = vsel %vm929_vm7, %v927_v10, %v744_v44 }
 0x195   : > { %v940_v37 = vsel %vm929_vm7, %v923_v3, %v736_v51 }
 0x196   : > { %v957_v54 = vsel %vm946_vm8, %v940_v37, %v800_v58 }
 0x197   : > { %1297 = vmatmul.msk.f32.gmra.mxu2 %vm972_vm9, %v957_v54 }
 0x19b   : > { %v592_v17 = vpop.permute.xlu1 %591  ;;  %v682_v52 = vpop.permute.xlu2 %681 }
 0x19c   : > { %v808_v24 = vpop.permute.xlu0 %807  ;;  %v898_v38 = vsel %vm895_vm5, %v1914_v53, %v592_v17  ;;  %v2167_v53 = vld [vmem:[%s2266_s2] ss:$0 sm:$0xff] }
 0x19d   : > { %v961_v22 = vsel %vm946_vm8, %v944_v1, %v808_v24 }
 0x19e   : > { %1301 = vmatmul.msk.f32.gmra.mxu3 %vm972_vm9, %v961_v22 }
 0x1a3   : > { %v656_v2 = vpop.permute.xlu1 %655  ;;  %v738_v7 = vpop.permute.xlu2 %737 }
 0x1a4   : > { %v554_v46 = vpop.permute.xlu0 %553  ;;  %v915_v23 = vsel %vm912_vm6, %v898_v38, %v656_v2 }
 0x1a5   : > { %v932_v41 = vsel %vm929_vm7, %v915_v23, %v720_v31  ;;  %v894_v12 = vsel %vm878_vm3, %v1899_v40, %v554_v46 }
 0x1ab   : > { %v618_v57 = vpop.permute.xlu1 %617  ;;  %v810_v18 = vpop.permute.xlu2 %809 }
 0x1ac   : > { %v610_v59 = vpop.permute.xlu0 %609  ;;  %v911_v26 = vsel %vm895_vm5, %v894_v12, %v618_v57 }
 0x1ad   : > { %v907_v15 = vsel %vm895_vm5, %v1960_v5, %v610_v59  ;;  %v928_v40 = vsel %vm912_vm6, %v911_v26, %v682_v52 }
 0x1b3   : > { %v674_v13 = vpop.permute.xlu1 %673  ;;  %v658_v35 = vpop.permute.xlu2 %657 }
 0x1b4   : > { %v728_v25 = vpop.permute.xlu0 %727  ;;  %v924_v32 = vsel %vm912_vm6, %v907_v15, %v674_v13 }
 0x1b5   : > { %v936_v56 = vsel %vm929_vm7, %v919_v60, %v728_v25  ;;  %v941_v61 = vsel %vm929_vm7, %v924_v32, %v738_v7 }
 0x1bb   : > { %v792_v9 = vpop.permute.xlu1 %791  ;;  %v730_v27 = vpop.permute.xlu2 %729 }
 0x1bc   : > { %v784_v16 = vpop.permute.xlu0 %783  ;;  %v953_v55 = vsel %vm946_vm8, %v936_v56, %v792_v9 }
 0x1bd   : > { %v949_v4 = vsel %vm946_vm8, %v932_v41, %v784_v16  ;;  %1293 = vmatmul.msk.f32.gmra.mxu1 %vm972_vm9, %v953_v55 }
 0x1be   : > { %1289 = vmatmul.msk.f32.gmra.mxu0 %vm972_vm9, %v949_v4 }
 0x1c0   : > { %v1066_v30 = vpop.f32.mrf.mxu2 }
 0x1c1   : > { %v1067_v29 = vadd.f32 %v2167_v53, %v1066_v30 }
 0x1c2   : > { %v1078_v34 = vpop.f32.mrf.mxu3 }
 0x1c3   : > { %1098 = vst [vmem:[%s2178_s7 + $0x40] sm:$0xff] %v1067_v29  ;;  %v1079_v5 = vadd.f32 %v2167_v53, %v1078_v34  ;;  %v802_v21 = vpop.permute.xlu1 %801 }
 0x1c4   : > { %v746_v49 = vpop.permute.xlu0 %745  ;;  %v958_v33 = vsel %vm946_vm8, %v941_v61, %v802_v21 }
 0x1c5   : > { %1102 = vst [vmem:[%s2178_s7 + $0x60] sm:$0xff] %v1079_v5  ;;  %v945_v42 = vsel %vm929_vm7, %v928_v40, %v746_v49  ;;  %1298 = vmatmul.msk.f32.gmra.mxu2 %vm972_vm9, %v958_v33 }
 0x1c6   : > { %v962_v39 = vsel %vm946_vm8, %v945_v42, %v810_v18 }
 0x1c7   : > { %1302 = vmatmul.msk.f32.gmra.mxu3 %vm972_vm9, %v962_v39 }
 0x1cb   : > { %v602_v20 = vpop.permute.xlu1 %601 }
 0x1cc   : > { %v594_v48 = vpop.permute.xlu0 %593  ;;  %v903_v43 = vsel %vm895_vm5, %v2003_v63, %v602_v20 }
 0x1cd   : > { %v899_v8 = vsel %vm895_vm5, %v1985_v45, %v594_v48 }
 0x1ce   : > { %v916_v28 = vsel %vm912_vm6, %v899_v8, %v658_v35 }
 0x1d3   : > { %v722_v19 = vpop.permute.xlu1 %721  ;;  %v1042_v47 = vpop.f32.mrf.mxu0 }
 0x1d4   : > { %v666_v0 = vpop.permute.xlu0 %665  ;;  %v1043_v58 = vadd.f32 %v2167_v53, %v1042_v47  ;;  %v933_v3 = vsel %vm929_vm7, %v916_v28, %v722_v19 }
 0x1d5   : > { %v920_v50 = vsel %vm912_vm6, %v903_v43, %v666_v0 }
 0x1d6   : > { %1090 = vst [vmem:[%s2178_s7] sm:$0xff] %v1043_v58  ;;  %v937_v44 = vsel %vm929_vm7, %v920_v50, %v730_v27 }
 0x1db   : > { %v794_v51 = vpop.permute.xlu1 %793 }
 0x1dc   : > { %v786_v11 = vpop.permute.xlu0 %785  ;;  %v954_v37 = vsel %vm946_vm8, %v937_v44, %v794_v51 }
 0x1dd   : > { %v950_v63 = vsel %vm946_vm8, %v933_v3, %v786_v11  ;;  %1294 = vmatmul.msk.f32.gmra.mxu1 %vm972_vm9, %v954_v37 }
 0x1de   : > { %1290 = vmatmul.msk.f32.gmra.mxu0 %vm972_vm9, %v950_v63 }
 0x1e3   : > { %v1054_v45 = vpop.f32.mrf.mxu1 }
 0x1e4   : > { %v1055_v54 = vadd.f32 %v2167_v53, %v1054_v45 }
 0x1e6   : > { %1094 = vst [vmem:[%s2178_s7 + $0x20] sm:$0xff] %v1055_v54 }
 0x1f0   : > { %v1081_v6 = vpop.f32.mrf.mxu3 }
 0x1f1   : > { %v1069_v36 = vpop.f32.mrf.mxu2  ;;  %v1082_v10 = vadd.f32 %v2167_v53, %v1081_v6 }
 0x1f2   : > { %v1070_v17 = vadd.f32 %v2167_v53, %v1069_v36 }
 0x1f3   : > { %1103 = vst [vmem:[%s2178_s7 + $0x68] sm:$0xff] %v1082_v10 }
 0x1f4   : > { %1099 = vst [vmem:[%s2178_s7 + $0x48] sm:$0xff] %v1070_v17 }
 0x203   : > { %v1057_v1 = vpop.f32.mrf.mxu1 }
 0x204   : > { %v1058_v24 = vadd.f32 %v2167_v53, %v1057_v1 }
 0x206   : > { %1095 = vst [vmem:[%s2178_s7 + $0x28] sm:$0xff] %v1058_v24 }
 0x20a   : > { %v1045_v22 = vpop.f32.mrf.mxu0 }
 0x20b   : > { %v1046_v62 = vadd.f32 %v2167_v53, %v1045_v22 }
 0x20d   : > { %1091 = vst [vmem:[%s2178_s7 + $0x8] sm:$0xff] %v1046_v62 }
 0x21a   : > { %v1072_v2 = vpop.f32.mrf.mxu2 }
 0x21b   : > { %v1073_v46 = vadd.f32 %v2167_v53, %v1072_v2 }
 0x21d   : > { %1100 = vst [vmem:[%s2178_s7 + $0x50] sm:$0xff] %v1073_v46 }
 0x221   : > { %v1084_v31 = vpop.f32.mrf.mxu3 }
 0x222   : > { %v1085_v57 = vadd.f32 %v2167_v53, %v1084_v31 }
 0x224   : > { %1104 = vst [vmem:[%s2178_s7 + $0x70] sm:$0xff] %v1085_v57 }
 0x23a   : > { %v1060_v59 = vpop.f32.mrf.mxu1 }
 0x23b   : > { %v1048_v52 = vpop.f32.mrf.mxu0  ;;  %v1061_v13 = vadd.f32 %v2167_v53, %v1060_v59 }
 0x23c   : > { %v1049_v25 = vadd.f32 %v2167_v53, %v1048_v52 }
 0x23d   : > { %1096 = vst [vmem:[%s2178_s7 + $0x30] sm:$0xff] %v1061_v13 }
 0x23e   : > { %1092 = vst [vmem:[%s2178_s7 + $0x10] sm:$0xff] %v1049_v25 }
 0x248   : > { %v1075_v38 = vpop.f32.mrf.mxu2 }
 0x249   : > { %v1076_v14 = vadd.f32 %v2167_v53, %v1075_v38 }
 0x24a   : > { %v1087_v23 = vpop.f32.mrf.mxu3 }
 0x24b   : > { %1101 = vst [vmem:[%s2178_s7 + $0x58] sm:$0xff] %v1076_v14  ;;  %v1088_v60 = vadd.f32 %v2167_v53, %v1087_v23 }
 0x24d   : > { %1105 = vst [vmem:[%s2178_s7 + $0x78] sm:$0xff] %v1088_v60 }
 0x25a   : > { %v1063_v56 = vpop.f32.mrf.mxu1 }
 0x25b   : > { %v1051_v7 = vpop.f32.mrf.mxu0  ;;  %v1064_v9 = vadd.f32 %v2167_v53, %v1063_v56 }
 0x25c   : > { %v1052_v41 = vadd.f32 %v2167_v53, %v1051_v7 }
 0x25d   : > { %1097 = vst [vmem:[%s2178_s7 + $0x38] sm:$0xff] %v1064_v9 }
 0x25e   : > { %1093 = vst [vmem:[%s2178_s7 + $0x18] sm:$0xff] %v1052_v41 }
 0x25f   : > { %1401 = shalt.err (!%p1398_p3)
}
 0x260   : > { %s1446_s28 = smov 128  }
 0x261   : > { %1325 = dma.vmem_to_hbm [thread:$0]  (%p1505_p5), %s1120_s17, 2048, %s1122_s19, %s1107_s20, %s1446_s28, %s1446_s28, %s1439_s30  }
 0x262 PF: > { %p1331_p4 = scmp.ge.s32.totalorder %s1436_s15, 2  ;;  %s1136_s5 = sand.u32 1, %s1424_s12  }
 0x263   : > { %s1137_s6 = scalar_lea.sflag [#allocation3], %s1136_s5 }
 0x264   : > { %p1328_p7 = pnand %p1331_p4, %p1509_p6 }
 0x266   : > { %p1329_p8 = pneg %p1328_p7 }
 0x268   : > { %1419 = dma.done.wait (%p1329_p8), %s1137_s6, 2048  }
 0x269   : > { %1421 = vsyncadd (%p1329_p8), %s1137_s6, 4294965248  ;;  %p13_p9 = scmp.ge.s32.totalorder %s1492_s18, 6   ;;  %s2270_s12 = smov %s1428_s13 }
 0x26a   : > { %s2271_s13 = smov %s1432_s14  ;;  %s2272_s14 = smov %s1503_s21 }
 0x26b   : > { %s2273_s15 = smov %s1492_s18  ;;  %15 = sbr.rel (!%p13_p9) target bundleno = 3 (0x3), region = 69 }
 0x270   :  { %1143 = vsyncpa [#allocation3], 1 }
 0x271   :  { %1145 = vsyncpa [#allocation3 + $0x1], 1 }

</bundles_post_ra>
